<compile_context>
chip_gen: v7x
topology: tpu7x:2x2x1
jax: 0.10.0
libtpu: 0.0.40
codegen_flags: <defaults>
</compile_context>

<pallas_src>
import jax
import jax.numpy as jnp
from jax.experimental import pallas as pl
from jax.experimental.pallas import tpu as pltpu

# ---- model dimensions (from the PyTorch module) ----
TS_IN = 3            # time_series_input_dim
HIDDEN = 64          # hidden_dim
IMG_LATENT = 128     # image_output_dim (autoencoder latent size)
EFFNET_FEAT = 1280   # EfficientNet-b0 _fc.in_features
OUT_DIM = 3          # output_dim

PACK_W = 8           # packed-output width (fc output + reconstruction)
RECON_OFF = 4        # reconstruction lives in lanes [4, 4 + TS_IN)

SUBLANE_PACK = 16    # bf16 packs 2 rows/sublane -> keep tiles 16-row aligned
MAX_TB = 2048        # batch-tile cap


def fusion_kernel(ts_ref, img_ref,
                  we1_ref, be1_ref, we2_ref, be2_ref,     # TS encoder
                  wd1_ref, bd1_ref,                       # TS decoder (hidden layer)
                  wf1_ts_ref, wf1_img_ref, bf1_ref,       # fusion fc layer 1 (split)
                  wpk_dec_ref, wpk_fc_ref, bpk_ref,       # packed final weights
                  packed_ref):
    x = ts_ref[...]                                       # [TB, 3] f32

    # --- TimeSeriesAutoencoder.encoder: Linear(3,64) -> ReLU -> Linear(64,128) ---
    h = jnp.maximum(
        jnp.dot(x, we1_ref[...], preferred_element_type=jnp.float32) + be1_ref[...], 0.0)
    latent = jnp.dot(h, we2_ref[...], preferred_element_type=jnp.float32) + be2_ref[...]

    # --- decoder hidden: Linear(128,64) -> ReLU ---
    hd = jnp.maximum(
        jnp.dot(latent, wd1_ref[...], preferred_element_type=jnp.float32) + bd1_ref[...], 0.0)

    # --- Fusion head layer 1: fc(cat([latent_ts, latent_image], dim=1)) ---
    # cat + matmul is computed as a split matmul (avoids in-kernel lane concat).
    # Image stream is cast to bf16 here (VPU, free under DMA-bound), so the
    # dominant HBM read happens exactly once in the caller's dtype; the MXU
    # runs bf16 x bf16 with f32 accumulation.
    img = img_ref[...].astype(jnp.bfloat16)
    pre = (jnp.dot(latent, wf1_ts_ref[...], preferred_element_type=jnp.float32)
           + jnp.dot(img, wf1_img_ref[...], preferred_element_type=jnp.float32)
           + bf1_ref[...])
    hf = jnp.maximum(pre, 0.0)
    # TODO(synk): Dropout(p=0.5) is identity in eval/inference mode; no PRNG path.

    # --- Packed output slab (TB, 8) ---
    # lanes [0, 3) : fc output  = hf @ Wf2 + bf2
    # lanes [4, 7) : recon      = hd @ Wd2 + bd2
    packed_ref[...] = (
        jnp.dot(hf, wpk_fc_ref[...], preferred_element_type=jnp.float32)
        + jnp.dot(hd, wpk_dec_ref[...], preferred_element_type=jnp.float32)
        + bpk_ref[...])


def _tensorcores_per_chip():
    """Best-effort number of TensorCores per chip (2 on v7x, 1 on v5e/v6e)."""
    try:
        info = pltpu.get_tpu_info()
        for attr in ("num_cores", "core_count", "tensorcores_per_chip",
                     "num_tensorcores"):
            v = getattr(info, attr, None)
            if isinstance(v, int) and 1 <= v <= 8:
                return v
    except Exception:
        pass
    try:
        kind = jax.devices()[0].device_kind.lower()
        if "7" in kind:
            return 2
    except Exception:
        pass
    return 1


def _vmem_physical_bytes():
    try:
        v = pltpu.get_tpu_info().vmem_capacity_bytes
        if isinstance(v, int) and v > 0:
            return v
    except Exception:
        pass
    return 64 << 20   # conservative (v7x per-TC VMEM)


def _pick_tile(B, max_tb=MAX_TB, cores=1):
    """Batch tile. Single-TC chips: one big tile (grid may be 1).
    Multi-TC chips (v7x): aim for a grid that is a multiple of the core count
    so both TensorCores get balanced work under dimension_semantics=('parallel',).
    Always returns a valid tile (<= B or 16-aligned); never crashes on awkward B."""
    if B <= max_tb:
        if cores >= 2 and B >= 2 * SUBLANE_PACK and B % (2 * SUBLANE_PACK) == 0:
            return B // 2                      # two balanced, 16-aligned steps
        return B                               # one step (block == full array dim)
    # Large batch: fixed 16-aligned tile; a ragged last block (if any) is padded
    # on read / clipped on write by Pallas, which is safe because every output
    # row depends only on its own input row.
    steps = -(-B // max_tb)
    if cores >= 2 and steps % cores:
        steps += cores - (steps % cores)
    tb = -(-B // steps)
    tb = ((tb + SUBLANE_PACK - 1) // SUBLANE_PACK) * SUBLANE_PACK
    return min(tb, max_tb)


def prepare_params(params):
    """One-time weight preparation (hoisted out of the per-call path):
    pack the two 64->3 output layers into 8-lane-wide weights/bias and cast
    the fc1 image-side weight to bf16."""
    wpk_dec = jnp.zeros((HIDDEN, PACK_W), jnp.float32).at[
        :, RECON_OFF:RECON_OFF + TS_IN].set(params["wd2"])
    wpk_fc = jnp.zeros((HIDDEN, PACK_W), jnp.float32).at[:, :OUT_DIM].set(params["wf2"])
    bpk = (jnp.zeros((1, PACK_W), jnp.float32)
           .at[:, :OUT_DIM].set(params["bf2"])
           .at[:, RECON_OFF:RECON_OFF + TS_IN].set(params["bd2"]))
    prepared = dict(params)
    prepared["wf1_img"] = params["wf1_img"].astype(jnp.bfloat16)
    prepared["wpk_dec"] = wpk_dec
    prepared["wpk_fc"] = wpk_fc
    prepared["bpk"] = bpk
    return prepared


def fusion_forward(time_series, image_feat, prepared):
    """Returns (output, reconstructed_time_series, latent_image) like the torch forward."""
    B = time_series.shape[0]
    cores = _tensorcores_per_chip()
    TB = _pick_tile(B, cores=cores)
    grid = (pl.cdiv(B, TB),)

    img_item = image_feat.dtype.itemsize
    ts_item = time_series.dtype.itemsize

    def batch_spec(d):
        return pl.BlockSpec((TB, d), lambda i: (i, 0))

    def full_spec(shape):
        return pl.BlockSpec(shape, lambda i: (0, 0))

    in_specs = [
        batch_spec(TS_IN),                                            # time_series
        batch_spec(EFFNET_FEAT),                                      # image features (native dtype)
        full_spec((TS_IN, HIDDEN)), full_spec((1, HIDDEN)),           # enc L1
        full_spec((HIDDEN, IMG_LATENT)), full_spec((1, IMG_LATENT)),  # enc L2
        full_spec((IMG_LATENT, HIDDEN)), full_spec((1, HIDDEN)),      # dec L1
        full_spec((IMG_LATENT, HIDDEN)),                              # fc1 (ts part)
        full_spec((EFFNET_FEAT, HIDDEN)),                             # fc1 (img part, bf16)
        full_spec((1, HIDDEN)),                                       # fc1 bias
        full_spec((HIDDEN, PACK_W)),                                  # packed dec L2 weight
        full_spec((HIDDEN, PACK_W)),                                  # packed fc2 weight
        full_spec((1, PACK_W)),                                       # packed bias
    ]
    out_spec = batch_spec(PACK_W)
    out_shape = jax.ShapeDtypeStruct((B, PACK_W), jnp.float32)

    # --- cost estimate (dominant term: the [B,1280]x[1280,64] matmul) ---
    weight_bytes = ((TS_IN * HIDDEN + HIDDEN
                     + HIDDEN * IMG_LATENT + IMG_LATENT
                     + IMG_LATENT * HIDDEN + HIDDEN
                     + IMG_LATENT * HIDDEN + HIDDEN
                     + 2 * HIDDEN * PACK_W + PACK_W) * 4
                    + EFFNET_FEAT * HIDDEN * 2)
    flops = 2 * B * (TS_IN * HIDDEN + HIDDEN * IMG_LATENT
                     + IMG_LATENT * HIDDEN + IMG_LATENT * HIDDEN
                     + EFFNET_FEAT * HIDDEN + 2 * HIDDEN * PACK_W)
    bytes_accessed = (B * TS_IN * ts_item + B * EFFNET_FEAT * img_item
                      + B * PACK_W * 4 + weight_bytes)
    cost = pl.CostEstimate(flops=flops, transcendentals=0,
                           bytes_accessed=bytes_accessed)

    # --- VMEM budget from the actual working set:
    #     double-buffered batch tiles + (double-buffered) resident weights + margin,
    #     clamped under physical VMEM (64 MiB on v7x).
    per_step = TB * (EFFNET_FEAT * img_item + TS_IN * ts_item + PACK_W * 4)
    vmem_needed = 2 * per_step + 2 * weight_bytes + (2 << 20)
    vmem_limit = max(min(vmem_needed, (_vmem_physical_bytes() * 7) // 8), 4 << 20)

    packed = pl.pallas_call(
        fusion_kernel,
        out_shape=out_shape,
        grid_spec=pltpu.PrefetchScalarGridSpec(
            num_scalar_prefetch=0,
            grid=grid,
            in_specs=in_specs,
            out_specs=out_spec,
        ),
        compiler_params=pltpu.CompilerParams(
            dimension_semantics=("parallel",),
            vmem_limit_bytes=int(vmem_limit)),
        cost_estimate=cost,
    )(time_series, image_feat,
      prepared["we1"], prepared["be1"], prepared["we2"], prepared["be2"],
      prepared["wd1"], prepared["bd1"],
      prepared["wf1_ts"], prepared["wf1_img"], prepared["bf1"],
      prepared["wpk_dec"], prepared["wpk_fc"], prepared["bpk"])

    output = packed[:, :OUT_DIM]
    reconstructed = packed[:, RECON_OFF:RECON_OFF + TS_IN]
    # latent_image in the torch module is just the EfficientNet feature vector.
    return output, reconstructed, image_feat


def init_params(key):
    ks = jax.random.split(key, 16)
    s = 0.05

    def w(k, shape):
        return (s * jax.random.normal(k, shape)).astype(jnp.float32)

    return {
        "we1": w(ks[0], (TS_IN, HIDDEN)),        "be1": w(ks[1], (1, HIDDEN)),
        "we2": w(ks[2], (HIDDEN, IMG_LATENT)),   "be2": w(ks[3], (1, IMG_LATENT)),
        "wd1": w(ks[4], (IMG_LATENT, HIDDEN)),   "bd1": w(ks[5], (1, HIDDEN)),
        "wd2": w(ks[6], (HIDDEN, TS_IN)),        "bd2": w(ks[7], (1, TS_IN)),
        "wf1_ts": w(ks[8], (IMG_LATENT, HIDDEN)),
        "wf1_img": w(ks[9], (EFFNET_FEAT, HIDDEN)),
        "bf1": w(ks[10], (1, HIDDEN)),
        "wf2": w(ks[11], (HIDDEN, OUT_DIM)),     "bf2": w(ks[12], (1, OUT_DIM)),
    }


def reference_forward(ts, img, p):
    """Pure-f32 JAX reference of the torch forward (eval mode)."""
    h = jnp.maximum(ts @ p["we1"] + p["be1"], 0.0)
    latent = h @ p["we2"] + p["be2"]
    hd = jnp.maximum(latent @ p["wd1"] + p["bd1"], 0.0)
    recon = hd @ p["wd2"] + p["bd2"]
    fused = jnp.concatenate([latent, img], axis=1)
    wf1 = jnp.concatenate([p["wf1_ts"], p["wf1_img"]], axis=0)
    hf = jnp.maximum(fused @ wf1 + p["bf1"], 0.0)
    out = hf @ p["wf2"] + p["bf2"]
    return out, recon


if __name__ == "__main__":
    key = jax.random.PRNGKey(0)
    k_ts, k_img, k_par = jax.random.split(key, 3)

    B = 16
    time_series = jax.random.normal(k_ts, (B, TS_IN), dtype=jnp.float32)
    # Stand-in for EfficientNet-b0 pooled features (see TODO at top of file).
    image_feat = jax.random.normal(k_img, (B, EFFNET_FEAT), dtype=jnp.float32)
    params = init_params(k_par)
    prepared = prepare_params(params)          # one-time weight packing / bf16 cast

    output, reconstructed, latent_image = fusion_forward(time_series, image_feat, prepared)
    jax.block_until_ready((output, reconstructed, latent_image))

    ref_out, ref_recon = reference_forward(time_series, image_feat, params)
    # Reconstruction path is pure f32 -> tight tolerance.
    assert jnp.allclose(reconstructed, ref_recon, atol=1e-4), "reconstruction mismatch"
    # Fusion output uses a bf16 image-feature dot -> looser tolerance (inference-grade).
    assert jnp.allclose(output, ref_out, atol=3e-2, rtol=3e-2), "output mismatch"
    assert output.shape == (B, OUT_DIM)
    assert reconstructed.shape == (B, TS_IN)
    assert latent_image.shape == (B, EFFNET_FEAT)

    print("KERNEL_OK")
</pallas_src>

<mosaic_0001>
module attributes {stable_mosaic.version = 11 : i64} {
  func.func @fusion_kernel(%arg0: i32, %arg1: memref<16x3xf32, #tpu.memory_space<vmem>>, %arg2: memref<16x1280xf32, #tpu.memory_space<vmem>>, %arg3: memref<3x64xf32, #tpu.memory_space<vmem>>, %arg4: memref<1x64xf32, #tpu.memory_space<vmem>>, %arg5: memref<64x128xf32, #tpu.memory_space<vmem>>, %arg6: memref<1x128xf32, #tpu.memory_space<vmem>>, %arg7: memref<128x64xf32, #tpu.memory_space<vmem>>, %arg8: memref<1x64xf32, #tpu.memory_space<vmem>>, %arg9: memref<128x64xf32, #tpu.memory_space<vmem>>, %arg10: memref<1280x64xbf16, #tpu.memory_space<vmem>>, %arg11: memref<1x64xf32, #tpu.memory_space<vmem>>, %arg12: memref<64x8xf32, #tpu.memory_space<vmem>>, %arg13: memref<64x8xf32, #tpu.memory_space<vmem>>, %arg14: memref<1x8xf32, #tpu.memory_space<vmem>>, %arg15: memref<16x8xf32, #tpu.memory_space<vmem>>) attributes {dimension_semantics = [#tpu.dimension_semantics<parallel>], iteration_bounds = array<i64: 1>, scalar_prefetch = 0 : i64, scratch_operands = 0 : i64, tpu.core_type = #tpu.core_type<tc>, window_params = [{transform_indices = @transform_0, window_bounds = array<i64: 16, 3>}, {transform_indices = @transform_1, window_bounds = array<i64: 16, 1280>}, {pipeline_mode = #tpu.pipeline_mode<synchronous>, transform_indices = @transform_2, window_bounds = array<i64: 3, 64>}, {pipeline_mode = #tpu.pipeline_mode<synchronous>, transform_indices = @transform_3, window_bounds = array<i64: 1, 64>}, {pipeline_mode = #tpu.pipeline_mode<synchronous>, transform_indices = @transform_4, window_bounds = array<i64: 64, 128>}, {pipeline_mode = #tpu.pipeline_mode<synchronous>, transform_indices = @transform_5, window_bounds = array<i64: 1, 128>}, {pipeline_mode = #tpu.pipeline_mode<synchronous>, transform_indices = @transform_6, window_bounds = array<i64: 128, 64>}, {pipeline_mode = #tpu.pipeline_mode<synchronous>, transform_indices = @transform_7, window_bounds = array<i64: 1, 64>}, {pipeline_mode = #tpu.pipeline_mode<synchronous>, transform_indices = @transform_8, window_bounds = array<i64: 128, 64>}, {pipeline_mode = #tpu.pipeline_mode<synchronous>, transform_indices = @transform_9, window_bounds = array<i64: 1280, 64>}, {pipeline_mode = #tpu.pipeline_mode<synchronous>, transform_indices = @transform_10, window_bounds = array<i64: 1, 64>}, {pipeline_mode = #tpu.pipeline_mode<synchronous>, transform_indices = @transform_11, window_bounds = array<i64: 64, 8>}, {pipeline_mode = #tpu.pipeline_mode<synchronous>, transform_indices = @transform_12, window_bounds = array<i64: 64, 8>}, {pipeline_mode = #tpu.pipeline_mode<synchronous>, transform_indices = @transform_13, window_bounds = array<i64: 1, 8>}, {transform_indices = @transform_14, window_bounds = array<i64: 16, 8>}]} {
    %c0 = arith.constant 0 : index
    %c0_0 = arith.constant 0 : index
    %0 = vector.load %arg1[%c0, %c0_0] : memref<16x3xf32, #tpu.memory_space<vmem>>, vector<16x3xf32>
    %c0_1 = arith.constant 0 : index
    %c0_2 = arith.constant 0 : index
    %1 = vector.load %arg3[%c0_1, %c0_2] : memref<3x64xf32, #tpu.memory_space<vmem>>, vector<3x64xf32>
    %cst = arith.constant dense<0.000000e+00> : vector<16x64xf32>
    %2 = tpu.matmul %0, %1, %cst {dimension_numbers = #tpu.dot_dimension_numbers<[1], [0], [0], [1], [0, 0, 1, 1], [], []>} : vector<16x3xf32>, vector<3x64xf32>, vector<16x64xf32> -> vector<16x64xf32>
    %c0_3 = arith.constant 0 : index
    %c0_4 = arith.constant 0 : index
    %3 = vector.load %arg4[%c0_3, %c0_4] : memref<1x64xf32, #tpu.memory_space<vmem>>, vector<1x64xf32>
    %4 = vector.broadcast %3 : vector<1x64xf32> to vector<16x64xf32>
    %5 = arith.addf %2, %4 : vector<16x64xf32>
    %cst_5 = arith.constant 0.000000e+00 : f32
    %6 = vector.broadcast %cst_5 : f32 to vector<16x64xf32>
    %7 = arith.maximumf %5, %6 : vector<16x64xf32>
    %c0_6 = arith.constant 0 : index
    %c0_7 = arith.constant 0 : index
    %8 = vector.load %arg5[%c0_6, %c0_7] : memref<64x128xf32, #tpu.memory_space<vmem>>, vector<64x128xf32>
    %cst_8 = arith.constant dense<0.000000e+00> : vector<16x128xf32>
    %9 = tpu.matmul %7, %8, %cst_8 {dimension_numbers = #tpu.dot_dimension_numbers<[1], [0], [0], [1], [0, 0, 1, 1], [], []>} : vector<16x64xf32>, vector<64x128xf32>, vector<16x128xf32> -> vector<16x128xf32>
    %c0_9 = arith.constant 0 : index
    %c0_10 = arith.constant 0 : index
    %10 = vector.load %arg6[%c0_9, %c0_10] : memref<1x128xf32, #tpu.memory_space<vmem>>, vector<1x128xf32>
    %11 = vector.broadcast %10 : vector<1x128xf32> to vector<16x128xf32>
    %12 = arith.addf %9, %11 : vector<16x128xf32>
    %c0_11 = arith.constant 0 : index
    %c0_12 = arith.constant 0 : index
    %13 = vector.load %arg7[%c0_11, %c0_12] : memref<128x64xf32, #tpu.memory_space<vmem>>, vector<128x64xf32>
    %cst_13 = arith.constant dense<0.000000e+00> : vector<16x64xf32>
    %14 = tpu.matmul %12, %13, %cst_13 {dimension_numbers = #tpu.dot_dimension_numbers<[1], [0], [0], [1], [0, 0, 1, 1], [], []>} : vector<16x128xf32>, vector<128x64xf32>, vector<16x64xf32> -> vector<16x64xf32>
    %c0_14 = arith.constant 0 : index
    %c0_15 = arith.constant 0 : index
    %15 = vector.load %arg8[%c0_14, %c0_15] : memref<1x64xf32, #tpu.memory_space<vmem>>, vector<1x64xf32>
    %16 = vector.broadcast %15 : vector<1x64xf32> to vector<16x64xf32>
    %17 = arith.addf %14, %16 : vector<16x64xf32>
    %cst_16 = arith.constant 0.000000e+00 : f32
    %18 = vector.broadcast %cst_16 : f32 to vector<16x64xf32>
    %19 = arith.maximumf %17, %18 : vector<16x64xf32>
    %c0_17 = arith.constant 0 : index
    %c0_18 = arith.constant 0 : index
    %20 = vector.load %arg2[%c0_17, %c0_18] : memref<16x1280xf32, #tpu.memory_space<vmem>>, vector<16x1280xf32>
    %21 = arith.truncf %20 : vector<16x1280xf32> to vector<16x1280xbf16>
    %c0_19 = arith.constant 0 : index
    %c0_20 = arith.constant 0 : index
    %22 = vector.load %arg9[%c0_19, %c0_20] : memref<128x64xf32, #tpu.memory_space<vmem>>, vector<128x64xf32>
    %cst_21 = arith.constant dense<0.000000e+00> : vector<16x64xf32>
    %23 = tpu.matmul %12, %22, %cst_21 {dimension_numbers = #tpu.dot_dimension_numbers<[1], [0], [0], [1], [0, 0, 1, 1], [], []>} : vector<16x128xf32>, vector<128x64xf32>, vector<16x64xf32> -> vector<16x64xf32>
    %c0_22 = arith.constant 0 : index
    %c0_23 = arith.constant 0 : index
    %24 = vector.load %arg10[%c0_22, %c0_23] : memref<1280x64xbf16, #tpu.memory_space<vmem>>, vector<1280x64xbf16>
    %cst_24 = arith.constant dense<0.000000e+00> : vector<16x64xf32>
    %25 = tpu.matmul %21, %24, %cst_24 {dimension_numbers = #tpu.dot_dimension_numbers<[1], [0], [0], [1], [0, 0, 1, 1], [], []>} : vector<16x1280xbf16>, vector<1280x64xbf16>, vector<16x64xf32> -> vector<16x64xf32>
    %26 = arith.addf %23, %25 : vector<16x64xf32>
    %c0_25 = arith.constant 0 : index
    %c0_26 = arith.constant 0 : index
    %27 = vector.load %arg11[%c0_25, %c0_26] : memref<1x64xf32, #tpu.memory_space<vmem>>, vector<1x64xf32>
    %28 = vector.broadcast %27 : vector<1x64xf32> to vector<16x64xf32>
    %29 = arith.addf %26, %28 : vector<16x64xf32>
    %cst_27 = arith.constant 0.000000e+00 : f32
    %30 = vector.broadcast %cst_27 : f32 to vector<16x64xf32>
    %31 = arith.maximumf %29, %30 : vector<16x64xf32>
    %c0_28 = arith.constant 0 : index
    %c0_29 = arith.constant 0 : index
    %32 = vector.load %arg13[%c0_28, %c0_29] : memref<64x8xf32, #tpu.memory_space<vmem>>, vector<64x8xf32>
    %cst_30 = arith.constant dense<0.000000e+00> : vector<16x8xf32>
    %33 = tpu.matmul %31, %32, %cst_30 {dimension_numbers = #tpu.dot_dimension_numbers<[1], [0], [0], [1], [0, 0, 1, 1], [], []>} : vector<16x64xf32>, vector<64x8xf32>, vector<16x8xf32> -> vector<16x8xf32>
    %c0_31 = arith.constant 0 : index
    %c0_32 = arith.constant 0 : index
    %34 = vector.load %arg12[%c0_31, %c0_32] : memref<64x8xf32, #tpu.memory_space<vmem>>, vector<64x8xf32>
    %cst_33 = arith.constant dense<0.000000e+00> : vector<16x8xf32>
    %35 = tpu.matmul %19, %34, %cst_33 {dimension_numbers = #tpu.dot_dimension_numbers<[1], [0], [0], [1], [0, 0, 1, 1], [], []>} : vector<16x64xf32>, vector<64x8xf32>, vector<16x8xf32> -> vector<16x8xf32>
    %36 = arith.addf %33, %35 : vector<16x8xf32>
    %c0_34 = arith.constant 0 : index
    %c0_35 = arith.constant 0 : index
    %37 = vector.load %arg14[%c0_34, %c0_35] : memref<1x8xf32, #tpu.memory_space<vmem>>, vector<1x8xf32>
    %38 = vector.broadcast %37 : vector<1x8xf32> to vector<16x8xf32>
    %39 = arith.addf %36, %38 : vector<16x8xf32>
    %c0_36 = arith.constant 0 : index
    %c0_37 = arith.constant 0 : index
    %40 = vector.load %arg15[%c0_36, %c0_37] : memref<16x8xf32, #tpu.memory_space<vmem>>, vector<16x8xf32>
    tpu.vector_store %arg15[%c0_36, %c0_37], %39 {strides = array<i32>} : memref<16x8xf32, #tpu.memory_space<vmem>>, vector<16x8xf32>,
    return
  }
  func.func @transform_0(%arg0: i32) -> (i32, i32) {
    %c0_i32 = arith.constant 0 : i32
    %c0_i32_0 = arith.constant 0 : i32
    return %arg0, %c0_i32 : i32, i32
  }
  func.func @transform_1(%arg0: i32) -> (i32, i32) {
    %c0_i32 = arith.constant 0 : i32
    %c0_i32_0 = arith.constant 0 : i32
    return %arg0, %c0_i32 : i32, i32
  }
  func.func @transform_2(%arg0: i32) -> (i32, i32) {
    %c0_i32 = arith.constant 0 : i32
    %c0_i32_0 = arith.constant 0 : i32
    %c0_i32_1 = arith.constant 0 : i32
    return %c0_i32, %c0_i32_0 : i32, i32
  }
  func.func @transform_3(%arg0: i32) -> (i32, i32) {
    %c0_i32 = arith.constant 0 : i32
    %c0_i32_0 = arith.constant 0 : i32
    %c0_i32_1 = arith.constant 0 : i32
    return %c0_i32, %c0_i32_0 : i32, i32
  }
  func.func @transform_4(%arg0: i32) -> (i32, i32) {
    %c0_i32 = arith.constant 0 : i32
    %c0_i32_0 = arith.constant 0 : i32
    %c0_i32_1 = arith.constant 0 : i32
    return %c0_i32, %c0_i32_0 : i32, i32
  }
  func.func @transform_5(%arg0: i32) -> (i32, i32) {
    %c0_i32 = arith.constant 0 : i32
    %c0_i32_0 = arith.constant 0 : i32
    %c0_i32_1 = arith.constant 0 : i32
    return %c0_i32, %c0_i32_0 : i32, i32
  }
  func.func @transform_6(%arg0: i32) -> (i32, i32) {
    %c0_i32 = arith.constant 0 : i32
    %c0_i32_0 = arith.constant 0 : i32
    %c0_i32_1 = arith.constant 0 : i32
    return %c0_i32, %c0_i32_0 : i32, i32
  }
  func.func @transform_7(%arg0: i32) -> (i32, i32) {
    %c0_i32 = arith.constant 0 : i32
    %c0_i32_0 = arith.constant 0 : i32
    %c0_i32_1 = arith.constant 0 : i32
    return %c0_i32, %c0_i32_0 : i32, i32
  }
  func.func @transform_8(%arg0: i32) -> (i32, i32) {
    %c0_i32 = arith.constant 0 : i32
    %c0_i32_0 = arith.constant 0 : i32
    %c0_i32_1 = arith.constant 0 : i32
    return %c0_i32, %c0_i32_0 : i32, i32
  }
  func.func @transform_9(%arg0: i32) -> (i32, i32) {
    %c0_i32 = arith.constant 0 : i32
    %c0_i32_0 = arith.constant 0 : i32
    %c0_i32_1 = arith.constant 0 : i32
    return %c0_i32, %c0_i32_0 : i32, i32
  }
  func.func @transform_10(%arg0: i32) -> (i32, i32) {
    %c0_i32 = arith.constant 0 : i32
    %c0_i32_0 = arith.constant 0 : i32
    %c0_i32_1 = arith.constant 0 : i32
    return %c0_i32, %c0_i32_0 : i32, i32
  }
  func.func @transform_11(%arg0: i32) -> (i32, i32) {
    %c0_i32 = arith.constant 0 : i32
    %c0_i32_0 = arith.constant 0 : i32
    %c0_i32_1 = arith.constant 0 : i32
    return %c0_i32, %c0_i32_0 : i32, i32
  }
  func.func @transform_12(%arg0: i32) -> (i32, i32) {
    %c0_i32 = arith.constant 0 : i32
    %c0_i32_0 = arith.constant 0 : i32
    %c0_i32_1 = arith.constant 0 : i32
    return %c0_i32, %c0_i32_0 : i32, i32
  }
  func.func @transform_13(%arg0: i32) -> (i32, i32) {
    %c0_i32 = arith.constant 0 : i32
    %c0_i32_0 = arith.constant 0 : i32
    %c0_i32_1 = arith.constant 0 : i32
    return %c0_i32, %c0_i32_0 : i32, i32
  }
  func.func @transform_14(%arg0: i32) -> (i32, i32) {
    %c0_i32 = arith.constant 0 : i32
    %c0_i32_0 = arith.constant 0 : i32
    return %arg0, %c0_i32 : i32, i32
  }
}

</mosaic_0001>

<bundles_post_ra>
// kernel: tpu_custom_call.1
= control target key start
LH: loop header
LB: loop body
LE: loop exit
PB: predicated region body
PF: predicated region fallthrough
CT: control target
= control target key end

     0   :  { %vm65_vm0 = vcmask 1042432   ;;  %vm58_vm1 = vcmask 23552   ;;  %vm161_vm2 = vcmask 523264   ;;  %vm1507_vm3 = vcmask 64512   ;;  %s2700_s2 = inlined_call_operand.vmem [shape: f32[3,64], index: 2, kind: input, shape index: {}]   ;;  %s2701_s0 = inlined_call_operand.vmem [shape: f32[16,3], index: 0, kind: input, shape index: {}]   ;;  %s2702_s4 = inlined_call_operand.vmem [shape: f32[64,128], index: 4, kind: input, shape index: {}]   ;;  %s2703_s6 = inlined_call_operand.vmem [shape: f32[128,64], index: 6, kind: input, shape index: {}]   ;;  %s2704_s9 = inlined_call_operand.vmem [shape: bf16[1280,64], index: 9, kind: input, shape index: {}]   ;;  %s2705_s3 = inlined_call_operand.vmem [shape: f32[1,64], index: 3, kind: input, shape index: {}]   ;;  %s2706_s1 = inlined_call_operand.vmem [shape: f32[16,1280], index: 1, kind: input, shape index: {}]   ;;  %s2707_s11 = inlined_call_operand.vmem [shape: f32[64,8], index: 11, kind: input, shape index: {}]   ;;  %s2708_s5 = inlined_call_operand.vmem [shape: f32[1,128], index: 5, kind: input, shape index: {}]   ;;  %s2709_s8 = inlined_call_operand.vmem [shape: f32[128,64], index: 8, kind: input, shape index: {}]   ;;  %s2710_s12 = inlined_call_operand.vmem [shape: f32[64,8], index: 12, kind: input, shape index: {}]   ;;  %s2711_s7 = inlined_call_operand.vmem [shape: f32[1,64], index: 7, kind: input, shape index: {}]   ;;  %s2712_s10 = inlined_call_operand.vmem [shape: f32[1,64], index: 10, kind: input, shape index: {}]   ;;  %s2713_s13 = inlined_call_operand.vmem [shape: f32[1,8], index: 13, kind: input, shape index: {}]   ;;  %s2714_s14 = inlined_call_operand.vmem [shape: f32[16,8], index: 14, kind: output, shape index: {}]  }
   0x1   :  { %v50_v0 = vld [vmem:[%s2700_s2] sm:$0x7]  ;;  %v49_v2 = vld [vmem:[%s2701_s0 + $0x8] sm:$0xff]  ;;  %v148_v5 = vld [vmem:[%s2702_s4 + $0x10] sm:$0xff] }
   0x2   :  { %v48_v1 = vld [vmem:[%s2701_s0] sm:$0xff]  ;;  %1787 = vmatprep.subr.msk.mxu0 %vm65_vm0, %v50_v0  ;;  %v147_v4 = vld [vmem:[%s2702_s4 + $0x8] sm:$0xff]  ;;  %v149_v7 = vld [vmem:[%s2702_s4 + $0x18] sm:$0xff] }
   0x3   :  { %1789 = vmatprep.mubr.msk.f32.mxu0 %vm58_vm1, %v48_v1  ;;  %v146_v3 = vld [vmem:[%s2702_s4] sm:$0xff]  ;;  %1788 = vmatpush3.msk.msra.mxu0 %vm65_vm0, %v50_v0  ;;  %v1923_v8 = vpack.c.bf16 %v149_v7, %v148_v5  ;;  %v151_v10 = vld [vmem:[%s2702_s4 + $0x28] sm:$0xff]  ;;  %v152_v12 = vld [vmem:[%s2702_s4 + $0x30] sm:$0xff] }
   0x4   :  { %v1919_v6 = vpack.c.bf16 %v147_v4, %v146_v3  ;;  %1790 = vmatmul.mubr.msk.f32.vlgmr.msra.gmra.mrb[0].mxu0 %vm58_vm1, %v49_v2  ;;  %v150_v9 = vld [vmem:[%s2702_s4 + $0x20] sm:$0xff]  ;;  %v153_v13 = vld [vmem:[%s2702_s4 + $0x38] sm:$0xff]  ;;  %v244_v16 = vld [vmem:[%s2703_s6 + $0x8] sm:$0xff] }
   0x5   :  { %v1927_v11 = vpack.c.bf16 %v151_v10, %v150_v9  ;;  %v1931_v14 = vpack.c.bf16 %v153_v13, %v152_v12  ;;  %v243_v15 = vld [vmem:[%s2703_s6] sm:$0xff]  ;;  %v245_v19 = vld [vmem:[%s2703_s6 + $0x10] sm:$0xff]  ;;  %v246_v20 = vld [vmem:[%s2703_s6 + $0x18] sm:$0xff] }
   0x6   :  { %1920 = vmatprep.subr.bf16.mxu1 %v1919_v6  ;;  %v1935_v17 = vpack.c.bf16 %v244_v16, %v243_v15  ;;  %v2033_v18 = vld [vmem:[%s2704_s9 + $0x40] sm:$0xff]   ;;  %v1939_v21 = vpack.c.bf16 %v246_v20, %v245_v19  ;;  %v248_v23 = vld [vmem:[%s2703_s6 + $0x28] sm:$0xff]  ;;  %v249_v25 = vld [vmem:[%s2703_s6 + $0x30] sm:$0xff] }
   0x7   :  { %1922 = vmatpush3.bf16.msra.mxu1 %v1919_v6  ;;  %v247_v22 = vld [vmem:[%s2703_s6 + $0x20] sm:$0xff]  ;;  %v250_v26 = vld [vmem:[%s2703_s6 + $0x38] sm:$0xff]  ;;  %v252_v29 = vld [vmem:[%s2703_s6 + $0x48] sm:$0xff] }
   0x8   :  { %1924 = vmatprep.subr.bf16.mxu1 %v1923_v8  ;;  %1936 = vmatprep.subr.bf16.mxu0 %v1935_v17  ;;  %v1943_v24 = vpack.c.bf16 %v248_v23, %v247_v22  ;;  %v1947_v27 = vpack.c.bf16 %v250_v26, %v249_v25  ;;  %v251_v28 = vld [vmem:[%s2703_s6 + $0x40] sm:$0xff]  ;;  %v253_v31 = vld [vmem:[%s2703_s6 + $0x50] sm:$0xff]  ;;  %v254_v32 = vld [vmem:[%s2703_s6 + $0x58] sm:$0xff] }
   0x9   :  { %1938 = vmatpush3.bf16.msra.mxu0 %v1935_v17  ;;  %v1951_v30 = vpack.c.bf16 %v252_v29, %v251_v28  ;;  %v1955_v33 = vpack.c.bf16 %v254_v32, %v253_v31  ;;  %v255_v34 = vld [vmem:[%s2703_s6 + $0x60] sm:$0xff]  ;;  %v256_v35 = vld [vmem:[%s2703_s6 + $0x68] sm:$0xff]  ;;  %v2037_v47 = vld [vmem:[%s2704_s9 + $0x50] sm:$0xff]  }
   0xa   :  { %1940 = vmatprep.subr.bf16.mxu0 %v1939_v21  ;;  %v1959_v36 = vpack.c.bf16 %v256_v35, %v255_v34  ;;  %v1514_v37 = vld [vmem:[%s2705_s3] ss:$0 sm:$0xff]  ;;  %v2035_v45 = vld [vmem:[%s2704_s9 + $0x48] sm:$0xff]   ;;  %v2038_v48 = vld [vmem:[%s2704_s9 + $0x10] sm:$0xff]  }
   0xb   :  { %1926 = vmatpush3.bf16.msra.mxu1 %v1923_v8  ;;  %v2034_v43 = vld [vmem:[%s2704_s9] sm:$0xff]   ;;  %v2036_v46 = vld [vmem:[%s2704_s9 + $0x8] sm:$0xff]   ;;  %v2039_v49 = vld [vmem:[%s2704_s9 + $0x58] sm:$0xff]  }
   0xc   :  { %1928 = vmatprep.subr.bf16.mxu1 %v1927_v11  ;;  %v2040_v50 = vld [vmem:[%s2704_s9 + $0x18] sm:$0xff]   ;;  %v2041_v51 = vld [vmem:[%s2704_s9 + $0x60] sm:$0xff]   ;;  %v2043_v53 = vld [vmem:[%s2704_s9 + $0x68] sm:$0xff]  }
   0xd   :  { %1942 = vmatpush3.bf16.msra.mxu0 %v1939_v21  ;;  %v2042_v52 = vld [vmem:[%s2704_s9 + $0x20] sm:$0xff]   ;;  %v2044_v54 = vld [vmem:[%s2704_s9 + $0x28] sm:$0xff]   ;;  %v2045_v55 = vld [vmem:[%s2704_s9 + $0x70] sm:$0xff]  }
   0xe   :  { %1944 = vmatprep.subr.bf16.mxu0 %v1943_v24  ;;  %v2046_v56 = vld [vmem:[%s2704_s9 + $0x30] sm:$0xff]   ;;  %v258_v58 = vld [vmem:[%s2703_s6 + $0x78] sm:$0xff]  ;;  %v2049_v62 = vld [vmem:[%s2704_s9 + $0xc0] sm:$0xff]  }
   0xf   :  { %1930 = vmatpush3.bf16.msra.mxu1 %v1927_v11  ;;  %v257_v57 = vld [vmem:[%s2703_s6 + $0x70] sm:$0xff]  ;;  %v2047_v60 = vld [vmem:[%s2704_s9 + $0x78] sm:$0xff]   ;;  %v344_v63 = vld [vmem:[%s2706_s1 + $0x8] sm:$0xff] }
  0x10   :  { %1932 = vmatprep.subr.bf16.mxu1 %v1931_v14  ;;  %v1963_v59 = vpack.c.bf16 %v258_v58, %v257_v57  ;;  %v2048_v61 = vld [vmem:[%s2704_s9 + $0x38] sm:$0xff]   ;;  %v2051_v2 = vld [vmem:[%s2704_s9 + $0x140] sm:$0xff]   ;;  %v353_v4 = vld [vmem:[%s2706_s1 + $0x50] sm:$0xff] }
  0x11   :  { %1946 = vmatpush3.bf16.msra.mxu0 %v1943_v24  ;;  %v354_v0 = vld [vmem:[%s2706_s1 + $0x58] sm:$0xff]  ;;  %v343_v3 = vld [vmem:[%s2706_s1] sm:$0xff]  ;;  %v2055_v7 = vld [vmem:[%s2704_s9 + $0x148] sm:$0xff]  }
  0x12   :  { %1948 = vmatprep.subr.bf16.mxu0 %v1947_v27  ;;  %v364_v1 = vpack.c.bf16 %v354_v0, %v344_v63  ;;  %v363_v5 = vpack.c.bf16 %v353_v4, %v343_v3  ;;  %v2052_v6 = vld [vmem:[%s2704_s9 + $0x100] sm:$0xff]   ;;  %v2056_v8 = vld [vmem:[%s2704_s9 + $0x108] sm:$0xff]   ;;  %v2059_v9 = vld [vmem:[%s2704_s9 + $0x150] sm:$0xff]  }
  0x13   :  { %1934 = vmatpush3.bf16.msra.mxu1 %v1931_v14  ;;  %v2060_v10 = vld [vmem:[%s2704_s9 + $0x110] sm:$0xff]   ;;  %v2063_v11 = vld [vmem:[%s2704_s9 + $0x158] sm:$0xff]   ;;  %v2067_v13 = vld [vmem:[%s2704_s9 + $0x160] sm:$0xff]  }
  0x14   :  { %1639 = vmatprep.subr.bf16.mxu1 %v2033_v18  ;;  %v2064_v12 = vld [vmem:[%s2704_s9 + $0x118] sm:$0xff]   ;;  %v2068_v14 = vld [vmem:[%s2704_s9 + $0x120] sm:$0xff]   ;;  %v2071_v15 = vld [vmem:[%s2704_s9 + $0x168] sm:$0xff]  }
  0x15   :  { %1950 = vmatpush3.bf16.msra.mxu0 %v1947_v27  ;;  %v2072_v16 = vld [vmem:[%s2704_s9 + $0x128] sm:$0xff]   ;;  %v2075_v17 = vld [vmem:[%s2704_s9 + $0x170] sm:$0xff]   ;;  %v2079_v19 = vld [vmem:[%s2704_s9 + $0x178] sm:$0xff]  }
  0x16   :  { %1952 = vmatprep.subr.bf16.mxu0 %v1951_v30  ;;  %v2076_v18 = vld [vmem:[%s2704_s9 + $0x130] sm:$0xff]   ;;  %v2080_v20 = vld [vmem:[%s2704_s9 + $0x138] sm:$0xff]   ;;  %v348_v21 = vld [vmem:[%s2706_s1 + $0x28] sm:$0xff] }
  0x17   :  { %v358_v22 = vld [vmem:[%s2706_s1 + $0x78] sm:$0xff]  ;;  %v347_v24 = vld [vmem:[%s2706_s1 + $0x20] sm:$0xff]  ;;  %v357_v25 = vld [vmem:[%s2706_s1 + $0x70] sm:$0xff] }
  0x18   :  { %v368_v23 = vpack.c.bf16 %v358_v22, %v348_v21  ;;  %v367_v26 = vpack.c.bf16 %v357_v25, %v347_v24  ;;  %v2083_v27 = vld [vmem:[%s2704_s9 + $0x240] sm:$0xff]   ;;  %v2087_v29 = vld [vmem:[%s2704_s9 + $0x248] sm:$0xff]   ;;  %v2091_v31 = vld [vmem:[%s2704_s9 + $0x250] sm:$0xff]  }
  0x19   :  { %1954 = vmatpush3.bf16.msra.mxu0 %v1951_v30  ;;  %v2084_v28 = vld [vmem:[%s2704_s9 + $0x200] sm:$0xff]   ;;  %v2088_v30 = vld [vmem:[%s2704_s9 + $0x208] sm:$0xff]   ;;  %v2092_v32 = vld [vmem:[%s2704_s9 + $0x210] sm:$0xff]  }
  0x1a   :  { %1956 = vmatprep.subr.bf16.mxu0 %v1955_v33  ;;  %v2096_v34 = vld [vmem:[%s2704_s9 + $0x218] sm:$0xff]   ;;  %v2099_v35 = vld [vmem:[%s2704_s9 + $0x260] sm:$0xff]   ;;  %v2053_v3 = vld [vmem:[%s2704_s9 + $0xc8] sm:$0xff]  }
  0x1b   :  { %v1518_v58 = vld [vmem:[%s2708_s5] ss:$0 sm:$0xff]  ;;  %v2054_v4 = vld [vmem:[%s2704_s9 + $0x88] sm:$0xff]  }
  0x1c   :  { %v2050_v0 = vld [vmem:[%s2704_s9 + $0x80] sm:$0xff]   ;;  %v360_v21 = vld [vmem:[%s2706_s1 + $0x88] sm:$0xff] }
  0x1d   :  { %1958 = vmatpush3.bf16.msra.mxu0 %v1955_v33  ;;  %v2095_v33 = vld [vmem:[%s2704_s9 + $0x258] sm:$0xff]   ;;  %v2085_v25 = vld [vmem:[%s2704_s9 + $0x1c8] sm:$0xff]  }
  0x1e   :  { %1960 = vmatprep.subr.bf16.mxu0 %v1959_v36 }
  0x21   :  { %1962 = vmatpush3.bf16.msra.mxu0 %v1959_v36  ;;  %v2100_v36 = vld [vmem:[%s2704_s9 + $0x220] sm:$0xff]  }
  0x22   :  { %1964 = vmatprep.subr.bf16.mxu0 %v1963_v59 }
  0x25   :  { %1966 = vmatpush3.bf16.msra.mxu0 %v1963_v59  ;;  %v346_v59 = vld [vmem:[%s2706_s1 + $0x18] sm:$0xff] }
  0x26   :  { %1661 = vmatprep.subr.bf16.mxu0 %v2049_v62 }
  0xd7   :  { %v1791_v38 = vpop.f32.mrb[0].mxu0 }
  0xd8   :  { %v141_v39 = vadd.f32 %v1791_v38, %v1514_v37  ;;  %v135_v40 = vpop.f32.mrb[1].mxu0  ;;  %v2104_v38 = vld [vmem:[%s2704_s9 + $0x228] sm:$0xff]  }
  0xd9   :  { %v136_v41 = vadd.f32 %v1514_v37, %v135_v40  ;;  %v2103_v37 = vld [vmem:[%s2704_s9 + $0x268] sm:$0xff]   ;;  %v2108_v40 = vld [vmem:[%s2704_s9 + $0x230] sm:$0xff]  }
  0xda   :  { %v145_v44 = vmax.f32 %v141_v39, 0.0  ;;  %v2107_v39 = vld [vmem:[%s2704_s9 + $0x270] sm:$0xff]  }
  0xdb   :  { %v144_v42 = vmax.f32 %v136_v41, 0.0  ;;  %v2111_v41 = vld [vmem:[%s2704_s9 + $0x278] sm:$0xff]  }
  0xdd   :  { %1808 = vmatprep.mubr.msk.f32.mxu1 %vm161_vm2, %v144_v42  ;;  %v2112_v42 = vld [vmem:[%s2704_s9 + $0x238] sm:$0xff]  }
  0xde   :  { %1809 = vmatmul.mubr.msk.f32.vlgmr.msra.gmra.mrb[0].mxu1 %vm161_vm2, %v145_v44  ;;  %v362_v44 = vld [vmem:[%s2706_s1 + $0x98] sm:$0xff] }
  0xdf   :  { %1640 = vmatpush3.bf16.msra.mxu1 %v2034_v43  ;;  %1061 = vmatprep.mubr.bf16.mxu1 %v364_v1  ;;  %v352_v43 = vld [vmem:[%s2706_s1 + $0x48] sm:$0xff] }
  0xe0   :  { %1641 = vmatprep.subr.bf16.mxu1 %v2035_v45  ;;  %v351_v45 = vld [vmem:[%s2706_s1 + $0x40] sm:$0xff] }
  0xe3   :  { %1642 = vmatpush3.bf16.msra.mxu1 %v2036_v46  ;;  %v361_v46 = vld [vmem:[%s2706_s1 + $0x90] sm:$0xff] }
  0xe4   :  { %1643 = vmatprep.subr.bf16.mxu1 %v2037_v47  ;;  %v372_v47 = vpack.c.bf16 %v362_v44, %v352_v43  ;;  %v375_v44 = vld [vmem:[%s2709_s8 + $0x10] sm:$0xff] }
  0xe7   :  { %1644 = vmatpush3.bf16.msra.mxu1 %v2038_v48  ;;  %v371_v48 = vpack.c.bf16 %v361_v46, %v351_v45  ;;  %v376_v45 = vld [vmem:[%s2709_s8 + $0x18] sm:$0xff] }
  0xe8   :  { %1645 = vmatprep.subr.bf16.mxu1 %v2039_v49  ;;  %v1328_v49 = vld [vmem:[%s2707_s11] sm:$0xff] }
  0xeb   :  { %1646 = vmatpush3.bf16.msra.mxu1 %v2040_v50  ;;  %v1329_v50 = vld [vmem:[%s2707_s11 + $0x8] sm:$0xff] }
  0xec   :  { %1647 = vmatprep.subr.bf16.mxu1 %v2041_v51  ;;  %v1330_v51 = vld [vmem:[%s2707_s11 + $0x10] sm:$0xff] }
  0xef   :  { %1648 = vmatpush3.bf16.msra.mxu1 %v2042_v52  ;;  %v1999_v52 = vpack.c.bf16 %v1329_v50, %v1328_v49  ;;  %v378_v49 = vld [vmem:[%s2709_s8 + $0x28] sm:$0xff] }
  0xf0   :  { %1649 = vmatprep.subr.bf16.mxu1 %v2043_v53  ;;  %v1331_v53 = vld [vmem:[%s2707_s11 + $0x18] sm:$0xff] }
  0xf3   :  { %1650 = vmatpush3.bf16.msra.mxu1 %v2044_v54  ;;  %v2003_v54 = vpack.c.bf16 %v1331_v53, %v1330_v51  ;;  %v379_v51 = vld [vmem:[%s2709_s8 + $0x30] sm:$0xff] }
  0xf4   :  { %1651 = vmatprep.subr.bf16.mxu1 %v2045_v55  ;;  %v1332_v55 = vld [vmem:[%s2707_s11 + $0x20] sm:$0xff] }
  0xf7   :  { %1652 = vmatpush3.bf16.msra.mxu1 %v2046_v56  ;;  %v1333_v56 = vld [vmem:[%s2707_s11 + $0x28] sm:$0xff] }
  0xf8   :  { %1653 = vmatprep.subr.bf16.mxu1 %v2047_v60  ;;  %v2007_v57 = vpack.c.bf16 %v1333_v56, %v1332_v55  ;;  %v356_v60 = vld [vmem:[%s2706_s1 + $0x68] sm:$0xff] }
  0xf9   :  { %v366_v1 = vpack.c.bf16 %v356_v60, %v346_v59  ;;  %v382_v55 = vld [vmem:[%s2709_s8 + $0x48] sm:$0xff]  ;;  %v385_v60 = vld [vmem:[%s2709_s8 + $0x60] sm:$0xff] }
  0xfb   :  { %1654 = vmatpush3.bf16.msra.mxu1 %v2048_v61 }
  0xfc   :  { %1683 = vmatprep.subr.bf16.mxu1 %v2051_v2 }
  0xfe   :  { %1062 = vmatmul.mubr.bf16.vlgmr.msra.gmra.mrb[4].mxu1 %v363_v5  ;;  %v2057_v5 = vld [vmem:[%s2704_s9 + $0xd0] sm:$0xff]  }
  0xff   :  { %1684 = vmatpush3.bf16.msra.mxu1 %v2052_v6  ;;  %1143 = vmatprep.mubr.bf16.mxu1 %v368_v23  ;;  %v2058_v6 = vld [vmem:[%s2704_s9 + $0x90] sm:$0xff]   ;;  %v2082_v23 = vld [vmem:[%s2704_s9 + $0x180] sm:$0xff]  }
 0x100   :  { %1685 = vmatprep.subr.bf16.mxu1 %v2055_v7  ;;  %v2061_v7 = vld [vmem:[%s2704_s9 + $0xd8] sm:$0xff]  }
 0x103   :  { %1686 = vmatpush3.bf16.msra.mxu1 %v2056_v8  ;;  %v2062_v8 = vld [vmem:[%s2704_s9 + $0x98] sm:$0xff]  }
 0x104   :  { %1687 = vmatprep.subr.bf16.mxu1 %v2059_v9  ;;  %v2065_v9 = vld [vmem:[%s2704_s9 + $0xe0] sm:$0xff]  }
 0x107   :  { %1688 = vmatpush3.bf16.msra.mxu1 %v2060_v10  ;;  %v2066_v10 = vld [vmem:[%s2704_s9 + $0xa0] sm:$0xff]  }
 0x108   :  { %1689 = vmatprep.subr.bf16.mxu1 %v2063_v11  ;;  %v2069_v11 = vld [vmem:[%s2704_s9 + $0xe8] sm:$0xff]  }
 0x10b   :  { %1690 = vmatpush3.bf16.msra.mxu1 %v2064_v12  ;;  %v2070_v12 = vld [vmem:[%s2704_s9 + $0xa8] sm:$0xff]  }
 0x10c   :  { %1691 = vmatprep.subr.bf16.mxu1 %v2067_v13  ;;  %v2073_v13 = vld [vmem:[%s2704_s9 + $0xf0] sm:$0xff]  }
 0x10f   :  { %1692 = vmatpush3.bf16.msra.mxu1 %v2068_v14  ;;  %v2074_v14 = vld [vmem:[%s2704_s9 + $0xb0] sm:$0xff]  }
 0x110   :  { %1693 = vmatprep.subr.bf16.mxu1 %v2071_v15  ;;  %v2077_v15 = vld [vmem:[%s2704_s9 + $0xf8] sm:$0xff]  }
 0x113   :  { %1694 = vmatpush3.bf16.msra.mxu1 %v2072_v16  ;;  %v2078_v16 = vld [vmem:[%s2704_s9 + $0xb8] sm:$0xff]  }
 0x114   :  { %1695 = vmatprep.subr.bf16.mxu1 %v2075_v17  ;;  %v345_v17 = vld [vmem:[%s2706_s1 + $0x10] sm:$0xff] }
 0x117   :  { %1696 = vmatpush3.bf16.msra.mxu1 %v2076_v18  ;;  %v355_v18 = vld [vmem:[%s2706_s1 + $0x60] sm:$0xff] }
 0x118   :  { %1697 = vmatprep.subr.bf16.mxu1 %v2079_v19  ;;  %v2081_v19 = vld [vmem:[%s2704_s9 + $0x1c0] sm:$0xff]   ;;  %v365_v22 = vpack.c.bf16 %v355_v18, %v345_v17 }
 0x11b   :  { %1698 = vmatpush3.bf16.msra.mxu1 %v2080_v20  ;;  %v350_v20 = vld [vmem:[%s2706_s1 + $0x38] sm:$0xff] }
 0x11c   :  { %1727 = vmatprep.subr.bf16.mxu1 %v2083_v27  ;;  %v370_v24 = vpack.c.bf16 %v360_v21, %v350_v20  ;;  %v2089_v27 = vld [vmem:[%s2704_s9 + $0x1d0] sm:$0xff]  }
 0x11e   :  { %1144 = vmatmul.mubr.bf16.vlgmr.msra.gmra.mrb[8].mxu1 %v367_v26  ;;  %v2086_v26 = vld [vmem:[%s2704_s9 + $0x188] sm:$0xff]  }
 0x11f   :  { %1728 = vmatpush3.bf16.msra.mxu1 %v2084_v28  ;;  %1225 = vmatprep.mubr.bf16.mxu1 %v372_v47  ;;  %v2090_v28 = vld [vmem:[%s2704_s9 + $0x190] sm:$0xff]   ;;  %v1971_v47 = vpack.c.bf16 %v376_v45, %v375_v44 }
 0x120   :  { %1729 = vmatprep.subr.bf16.mxu1 %v2087_v29  ;;  %v2093_v29 = vld [vmem:[%s2704_s9 + $0x1d8] sm:$0xff]  }
 0x123   :  { %1730 = vmatpush3.bf16.msra.mxu1 %v2088_v30  ;;  %v2094_v30 = vld [vmem:[%s2704_s9 + $0x198] sm:$0xff]  }
 0x124   :  { %1731 = vmatprep.subr.bf16.mxu1 %v2091_v31  ;;  %v2097_v31 = vld [vmem:[%s2704_s9 + $0x1e0] sm:$0xff]  }
 0x127   :  { %1732 = vmatpush3.bf16.msra.mxu1 %v2092_v32  ;;  %v2098_v32 = vld [vmem:[%s2704_s9 + $0x1a0] sm:$0xff]  }
 0x128   :  { %1733 = vmatprep.subr.bf16.mxu1 %v2095_v33  ;;  %v2101_v33 = vld [vmem:[%s2704_s9 + $0x1e8] sm:$0xff]  }
 0x12b   :  { %1734 = vmatpush3.bf16.msra.mxu1 %v2096_v34  ;;  %v2102_v34 = vld [vmem:[%s2704_s9 + $0x1a8] sm:$0xff]  }
 0x12c   :  { %1735 = vmatprep.subr.bf16.mxu1 %v2099_v35  ;;  %v2105_v35 = vld [vmem:[%s2704_s9 + $0x1f0] sm:$0xff]  }
 0x12f   :  { %1736 = vmatpush3.bf16.msra.mxu1 %v2100_v36  ;;  %v2106_v36 = vld [vmem:[%s2704_s9 + $0x1b0] sm:$0xff]  }
 0x130   :  { %1737 = vmatprep.subr.bf16.mxu1 %v2103_v37  ;;  %v2109_v37 = vld [vmem:[%s2704_s9 + $0x1f8] sm:$0xff]  }
 0x133   :  { %1738 = vmatpush3.bf16.msra.mxu1 %v2104_v38  ;;  %v373_v38 = vld [vmem:[%s2709_s8] sm:$0xff] }
 0x134   :  { %1739 = vmatprep.subr.bf16.mxu1 %v2107_v39  ;;  %v374_v39 = vld [vmem:[%s2709_s8 + $0x8] sm:$0xff] }
 0x135   :  { %v1967_v43 = vpack.c.bf16 %v374_v39, %v373_v38  ;;  %v1326_v39 = vld [vmem:[%s2710_s12 + $0x30] sm:$0xff] }
 0x137   :  { %1740 = vmatpush3.bf16.msra.mxu1 %v2108_v40  ;;  %v2110_v40 = vld [vmem:[%s2704_s9 + $0x1b8] sm:$0xff]  }
 0x138   :  { %1741 = vmatprep.subr.bf16.mxu1 %v2111_v41  ;;  %v349_v41 = vld [vmem:[%s2706_s1 + $0x30] sm:$0xff] }
 0x13b   :  { %1742 = vmatpush3.bf16.msra.mxu1 %v2112_v42  ;;  %v359_v42 = vld [vmem:[%s2706_s1 + $0x80] sm:$0xff] }
 0x13c   :  { %2000 = vmatprep.subr.bf16.mxu1 %v1999_v52  ;;  %v369_v46 = vpack.c.bf16 %v359_v42, %v349_v41 }
 0x13e   :  { %1226 = vmatmul.mubr.bf16.vlgmr.msra.gmra.mrb[12].mxu1 %v371_v48  ;;  %v377_v48 = vld [vmem:[%s2709_s8 + $0x20] sm:$0xff] }
 0x13f   :  { %2002 = vmatpush3.bf16.msra.mxu1 %v1999_v52  ;;  %v1975_v50 = vpack.c.bf16 %v378_v49, %v377_v48  ;;  %v380_v52 = vld [vmem:[%s2709_s8 + $0x38] sm:$0xff] }
 0x140   :  { %2004 = vmatprep.subr.bf16.mxu1 %v2003_v54  ;;  %v1979_v53 = vpack.c.bf16 %v380_v52, %v379_v51 }
 0x143   :  { %2006 = vmatpush3.bf16.msra.mxu1 %v2003_v54  ;;  %v381_v54 = vld [vmem:[%s2709_s8 + $0x40] sm:$0xff] }
 0x144   :  { %2008 = vmatprep.subr.bf16.mxu1 %v2007_v57  ;;  %v1983_v56 = vpack.c.bf16 %v382_v55, %v381_v54 }
 0x147   :  { %2010 = vmatpush3.bf16.msra.mxu1 %v2007_v57  ;;  %v383_v57 = vld [vmem:[%s2709_s8 + $0x50] sm:$0xff] }
 0x1b1   :  { %v1810_v61 = vpop.f32.mrb[0].mxu1 }
 0x1b2   :  { %v234_v62 = vpop.f32.mrb[1].mxu1  ;;  %v2489_v2 = vadd.f32 %v1810_v61, %v1518_v58  ;;  %v386_v61 = vld [vmem:[%s2709_s8 + $0x68] sm:$0xff] }
 0x1b3   :  { %v2484_v63 = vadd.f32 %v1518_v58, %v234_v62  ;;  %v384_v58 = vld [vmem:[%s2709_s8 + $0x58] sm:$0xff]  ;;  %v1991_v62 = vpack.c.bf16 %v386_v61, %v385_v60 }
 0x1b4   :  { %v1987_v59 = vpack.c.bf16 %v384_v58, %v383_v57 }
 0x1b5   :  { %1843 = vmatprep.mubr.f32.mxu0 %v2484_v63 }
 0x1b6   :  { %1844 = vmatmul.mubr.f32.vlgmr.msra.gmra.mrb[2].mxu0 %v2489_v2 }
 0x1b7   :  { %1662 = vmatpush3.bf16.msra.mxu0 %v2050_v0  ;;  %1102 = vmatprep.mubr.bf16.mxu0 %v366_v1  ;;  %v388_v0 = vld [vmem:[%s2709_s8 + $0x78] sm:$0xff]  ;;  %v1334_v1 = vld [vmem:[%s2707_s11 + $0x30] sm:$0xff] }
 0x1b8   :  { %1663 = vmatprep.subr.bf16.mxu0 %v2053_v3  ;;  %v1335_v3 = vld [vmem:[%s2707_s11 + $0x38] sm:$0xff] }
 0x1bb   :  { %1664 = vmatpush3.bf16.msra.mxu0 %v2054_v4  ;;  %v2011_v4 = vpack.c.bf16 %v1335_v3, %v1334_v1 }
 0x1bc   :  { %1665 = vmatprep.subr.bf16.mxu0 %v2057_v5 }
 0x1bd   :  { %2012 = vmatprep.subr.bf16.mxu1 %v2011_v4 }
 0x1be   :  { %2014 = vmatpush3.bf16.msra.mxu1 %v2011_v4 }
 0x1bf   :  { %1666 = vmatpush3.bf16.msra.mxu0 %v2058_v6 }
 0x1c0   :  { %1667 = vmatprep.subr.bf16.mxu0 %v2061_v7 }
 0x1c3   :  { %1668 = vmatpush3.bf16.msra.mxu0 %v2062_v8 }
 0x1c4   :  { %1669 = vmatprep.subr.bf16.mxu0 %v2065_v9 }
 0x1c7   :  { %1670 = vmatpush3.bf16.msra.mxu0 %v2066_v10 }
 0x1c8   :  { %1671 = vmatprep.subr.bf16.mxu0 %v2069_v11 }
 0x1cb   :  { %1672 = vmatpush3.bf16.msra.mxu0 %v2070_v12 }
 0x1cc   :  { %1673 = vmatprep.subr.bf16.mxu0 %v2073_v13 }
 0x1cf   :  { %1674 = vmatpush3.bf16.msra.mxu0 %v2074_v14 }
 0x1d0   :  { %1675 = vmatprep.subr.bf16.mxu0 %v2077_v15 }
 0x1d1   :  { %v1655_v6 = vpop.f32.mrb[4].mxu1 }
 0x1d2   :  { %v1656_v7 = vpop.f32.mrb[5].mxu1 }
 0x1d3   :  { %1676 = vmatpush3.bf16.msra.mxu0 %v2078_v16  ;;  %v1657_v8 = vadd.f32 %v1656_v7, %v1655_v6  ;;  %v1658_v9 = vpop.f32.mrb[6].mxu1 }
 0x1d4   :  { %1705 = vmatprep.subr.bf16.mxu0 %v2081_v19  ;;  %v1659_v10 = vpop.f32.mrb[7].mxu1 }
 0x1d5   :  { %v1660_v11 = vadd.f32 %v1659_v10, %v1658_v9 }
 0x1d6   :  { %1103 = vmatmul.mubr.bf16.vlgmr.msra.gmra.mrb[4].mxu0 %v365_v22 }
 0x1d7   :  { %1706 = vmatpush3.bf16.msra.mxu0 %v2082_v23  ;;  %1184 = vmatprep.mubr.bf16.mxu0 %v370_v24  ;;  %v1320_v24 = vld [vmem:[%s2710_s12] sm:$0xff] }
 0x1d8   :  { %1707 = vmatprep.subr.bf16.mxu0 %v2085_v25 }
 0x1db   :  { %1708 = vmatpush3.bf16.msra.mxu0 %v2086_v26  ;;  %v1521_v26 = vld [vmem:[%s2711_s7] ss:$0 sm:$0xff] }
 0x1dc   :  { %1709 = vmatprep.subr.bf16.mxu0 %v2089_v27 }
 0x1df   :  { %1710 = vmatpush3.bf16.msra.mxu0 %v2090_v28 }
 0x1e0   :  { %1711 = vmatprep.subr.bf16.mxu0 %v2093_v29 }
 0x1e3   :  { %1712 = vmatpush3.bf16.msra.mxu0 %v2094_v30 }
 0x1e4   :  { %1713 = vmatprep.subr.bf16.mxu0 %v2097_v31  ;;  %v1322_v31 = vld [vmem:[%s2710_s12 + $0x10] sm:$0xff] }
 0x1e7   :  { %1714 = vmatpush3.bf16.msra.mxu0 %v2098_v32  ;;  %v1323_v32 = vld [vmem:[%s2710_s12 + $0x18] sm:$0xff] }
 0x1e8   :  { %1715 = vmatprep.subr.bf16.mxu0 %v2101_v33 }
 0x1eb   :  { %1716 = vmatpush3.bf16.msra.mxu0 %v2102_v34 }
 0x1ec   :  { %1717 = vmatprep.subr.bf16.mxu0 %v2105_v35  ;;  %v2019_v35 = vpack.c.bf16 %v1323_v32, %v1322_v31 }
 0x1ef   :  { %1718 = vmatpush3.bf16.msra.mxu0 %v2106_v36  ;;  %v1324_v36 = vld [vmem:[%s2710_s12 + $0x20] sm:$0xff] }
 0x1f0   :  { %1719 = vmatprep.subr.bf16.mxu0 %v2109_v37  ;;  %v1325_v37 = vld [vmem:[%s2710_s12 + $0x28] sm:$0xff] }
 0x1f1   :  { %v1699_v12 = vpop.f32.mrb[8].mxu1  ;;  %v2023_v38 = vpack.c.bf16 %v1325_v37, %v1324_v36 }
 0x1f2   :  { %v1700_v13 = vpop.f32.mrb[9].mxu1 }
 0x1f3   :  { %1720 = vmatpush3.bf16.msra.mxu0 %v2110_v40  ;;  %v1701_v14 = vadd.f32 %v1700_v13, %v1699_v12  ;;  %v1702_v15 = vpop.f32.mrb[10].mxu1  ;;  %v1327_v40 = vld [vmem:[%s2710_s12 + $0x38] sm:$0xff] }
 0x1f4   :  { %1968 = vmatprep.subr.bf16.mxu0 %v1967_v43  ;;  %v1703_v16 = vpop.f32.mrb[11].mxu1  ;;  %v2027_v41 = vpack.c.bf16 %v1327_v40, %v1326_v39 }
 0x1f5   :  { %v1704_v17 = vadd.f32 %v1703_v16, %v1702_v15 }
 0x1f6   :  { %1185 = vmatmul.mubr.bf16.vlgmr.msra.gmra.mrb[8].mxu0 %v369_v46 }
 0x1f7   :  { %1970 = vmatpush3.bf16.msra.mxu0 %v1967_v43  ;;  %1878 = vmatprep.mubr.f32.mxu0 %v2484_v63  ;;  %v387_v63 = vld [vmem:[%s2709_s8 + $0x70] sm:$0xff] }
 0x1f8   :  { %1972 = vmatprep.subr.bf16.mxu0 %v1971_v47  ;;  %v1995_v5 = vpack.c.bf16 %v388_v0, %v387_v63  ;;  %v1602_v63 = vld [vmem:[%s2712_s10] ss:$0 sm:$0xff] }
 0x1fb   :  { %1974 = vmatpush3.bf16.msra.mxu0 %v1971_v47 }
 0x1fc   :  { %1976 = vmatprep.subr.bf16.mxu0 %v1975_v50 }
 0x1ff   :  { %1978 = vmatpush3.bf16.msra.mxu0 %v1975_v50 }
 0x200   :  { %1980 = vmatprep.subr.bf16.mxu0 %v1979_v53 }
 0x203   :  { %1982 = vmatpush3.bf16.msra.mxu0 %v1979_v53 }
 0x204   :  { %1984 = vmatprep.subr.bf16.mxu0 %v1983_v56 }
 0x207   :  { %1986 = vmatpush3.bf16.msra.mxu0 %v1983_v56 }
 0x208   :  { %1988 = vmatprep.subr.bf16.mxu0 %v1987_v59 }
 0x20b   :  { %1990 = vmatpush3.bf16.msra.mxu0 %v1987_v59 }
 0x20c   :  { %1992 = vmatprep.subr.bf16.mxu0 %v1991_v62 }
 0x20f   :  { %1994 = vmatpush3.bf16.msra.mxu0 %v1991_v62 }
 0x210   :  { %1996 = vmatprep.subr.bf16.mxu0 %v1995_v5 }
 0x211   :  { %v1743_v18 = vpop.f32.mrb[12].mxu1 }
 0x212   :  { %v1744_v19 = vpop.f32.mrb[13].mxu1 }
 0x213   :  { %1998 = vmatpush3.bf16.msra.mxu0 %v1995_v5  ;;  %v1745_v20 = vadd.f32 %v1744_v19, %v1743_v18  ;;  %v1746_v21 = vpop.f32.mrb[14].mxu1 }
 0x214   :  { %v1747_v22 = vpop.f32.mrb[15].mxu1 }
 0x215   :  { %v1748_v23 = vadd.f32 %v1747_v22, %v1746_v21 }
 0x216   :  { %1879 = vmatmul.mubr.f32.vlgmr.msra.gmra.mrb[12].mxu0 %v2489_v2  ;;  %v1321_v2 = vld [vmem:[%s2710_s12 + $0x8] sm:$0xff] }
 0x217   :  { %v2015_v25 = vpack.c.bf16 %v1321_v2, %v1320_v24 }
 0x219   :  { %2016 = vmatprep.subr.bf16.mxu1 %v2015_v25 }
 0x289   :  { %v1845_v27 = vpop.f32.mrb[2].mxu0 }
 0x28a   :  { %v338_v28 = vadd.f32 %v1845_v27, %v1521_v26  ;;  %v332_v29 = vpop.f32.mrb[3].mxu0 }
 0x28b   :  { %v333_v30 = vadd.f32 %v1521_v26, %v332_v29 }
 0x28c   :  { %v342_v34 = vmax.f32 %v338_v28, 0.0 }
 0x28d   :  { %v341_v33 = vmax.f32 %v333_v30, 0.0 }
 0x28f   :  { %1897 = vmatprep.mubr.msk.f32.mxu1 %vm161_vm2, %v341_v33 }
 0x290   :  { %1898 = vmatmul.mubr.msk.f32.vlgmr.msra.gmra.mrb[2].mxu1 %vm161_vm2, %v342_v34 }
 0x291   :  { %2018 = vmatpush3.bf16.msra.mxu1 %v2015_v25 }
 0x292   :  { %2020 = vmatprep.subr.bf16.mxu1 %v2019_v35 }
 0x295   :  { %2022 = vmatpush3.bf16.msra.mxu1 %v2019_v35 }
 0x296   :  { %2024 = vmatprep.subr.bf16.mxu1 %v2023_v38 }
 0x299   :  { %2026 = vmatpush3.bf16.msra.mxu1 %v2023_v38 }
 0x29a   :  { %2028 = vmatprep.subr.bf16.mxu1 %v2027_v41 }
 0x29d   :  { %2030 = vmatpush3.bf16.msra.mxu1 %v2027_v41 }
 0x2a9   :  { %v1677_v42 = vpop.f32.mrb[4].mxu0 }
 0x2aa   :  { %v1678_v43 = vpop.f32.mrb[5].mxu0 }
 0x2ab   :  { %v1679_v44 = vadd.f32 %v1678_v43, %v1677_v42  ;;  %v1680_v45 = vpop.f32.mrb[6].mxu0 }
 0x2ac   :  { %v1681_v46 = vpop.f32.mrb[7].mxu0 }
 0x2ad   :  { %v1105_v47 = vadd.f32 %v1679_v44, %v1657_v8  ;;  %v1682_v48 = vadd.f32 %v1681_v46, %v1680_v45  ;;  %v1607_v8 = vld [vmem:[%s2713_s13] ss:$0 sm:$0xff] }
 0x2af   :  { %v1108_v49 = vadd.f32 %v1682_v48, %v1660_v11  ;;  %v1146_v50 = vadd.f32 %v1701_v14, %v1105_v47 }
 0x2b1   :  { %v1149_v51 = vadd.f32 %v1704_v17, %v1108_v49 }
 0x2c9   :  { %v1721_v52 = vpop.f32.mrb[8].mxu0 }
 0x2ca   :  { %v1722_v53 = vpop.f32.mrb[9].mxu0 }
 0x2cb   :  { %v1723_v54 = vadd.f32 %v1722_v53, %v1721_v52  ;;  %v1724_v55 = vpop.f32.mrb[10].mxu0 }
 0x2cc   :  { %v1725_v56 = vpop.f32.mrb[11].mxu0 }
 0x2cd   :  { %v1187_v57 = vadd.f32 %v1723_v54, %v1146_v50  ;;  %v1726_v58 = vadd.f32 %v1725_v56, %v1724_v55 }
 0x2cf   :  { %v1190_v59 = vadd.f32 %v1726_v58, %v1149_v51  ;;  %v1228_v60 = vadd.f32 %v1745_v20, %v1187_v57 }
 0x2d1   :  { %v1231_v61 = vadd.f32 %v1748_v23, %v1190_v59 }
 0x2e9   :  { %v1880_v62 = vpop.f32.mrb[12].mxu0 }
 0x2ea   :  { %v1306_v0 = vadd.f32 %v1880_v62, %v1231_v61  ;;  %v1300_v1 = vpop.f32.mrb[13].mxu0 }
 0x2eb   :  { %v1301_v3 = vadd.f32 %v1300_v1, %v1228_v60 }
 0x2ec   :  { %v1317_v4 = vadd.f32 %v1602_v63, %v1306_v0 }
 0x2ed   :  { %v1316_v5 = vadd.f32 %v1602_v63, %v1301_v3 }
 0x2ee   :  { %v1319_v7 = vmax.f32 %v1317_v4, 0.0 }
 0x2ef   :  { %v1318_v6 = vmax.f32 %v1316_v5, 0.0 }
 0x2f1   :  { %1916 = vmatprep.mubr.msk.f32.mxu1 %vm161_vm2, %v1318_v6 }
 0x2f2   :  { %1917 = vmatmul.mubr.msk.f32.vlgmr.msra.gmra.mrb[2].mxu1 %vm161_vm2, %v1319_v7 }
 0x3c5   :  { %v1918_v9 = vpop.f32.mrb[2].mxu1 }
 0x3c6   :  { %v1506_v10 = vadd.f32 %v1918_v9, %v1607_v8  ;;  %v1489_v11 = vpop.f32.mrb[3].mxu1 }
 0x3c7   :  { %v1505_v12 = vadd.f32 %v1607_v8, %v1489_v11 }
 0x3c8   :  { %1509 = vst.msk [vmem:[%s2714_s14 + $0x8] sm:$0xff] %vm1507_vm3, %v1506_v10 }
 0x3c9   :  { %1508 = vst.msk [vmem:[%s2714_s14] sm:$0xff] %vm1507_vm3, %v1505_v12 }

</bundles_post_ra>
